<compile_context>
chip_gen: v5e
topology: v5e:2x2
jax: 0.10.0
libtpu: 0.0.40
codegen_flags: <defaults>
</compile_context>

<pallas_src>
import functools
import math

import jax
import jax.numpy as jnp
from jax.experimental import pallas as pl
from jax.experimental.pallas import tpu as pltpu


# -----------------------------------------------------------------------------
# Kernel 1: single-evaluation dynamics  (BouncingBallExample.forward)
# -----------------------------------------------------------------------------
def _bouncing_ball_forward_kernel(neg_grav_ref, vel_ref, out_ref):
    """Dynamics of the bouncing ball.

    neg_grav_ref : SMEM (1,)   f32 -- precomputed -gravity (no in-kernel negate)
    vel_ref      : VMEM (1, L) f32 -- velocity
    out_ref      : VMEM (3, L) f32 -- row 0: dpos, row 1: dvel, row 2: dlog_radius
    """
    vel = vel_ref[...]                                       # (1, L)
    out_ref[0:1, :] = vel                                    # dpos        = vel
    out_ref[1:2, :] = jnp.full_like(vel, neg_grav_ref[0])    # dvel        = -gravity
    out_ref[2:3, :] = jnp.zeros_like(vel)                    # dlog_radius = 0


@jax.jit
def bouncing_ball_forward(t, state, neg_gravity):
    """Pallas-backed equivalent of BouncingBallExample.forward(t, state).

    `t` and `pos` are accepted for interface parity but are unused by the
    dynamics, so they are not routed through the kernel (no wasted DMAs).
    """
    pos, vel, log_radius = state
    del t, pos  # unused by the dynamics
    L = vel.shape[0]
    # Packed (3, L) layout assumes dvel / dlog_radius rows fit inside L.
    assert neg_gravity.shape[0] <= L and log_radius.shape[0] <= L

    out = pl.pallas_call(
        _bouncing_ball_forward_kernel,
        out_shape=jax.ShapeDtypeStruct((3, L), vel.dtype),
        in_specs=[
            pl.BlockSpec(memory_space=pltpu.MemorySpace.SMEM),  # -gravity scalar
            pl.BlockSpec(memory_space=pltpu.MemorySpace.VMEM),  # vel tile
        ],
        out_specs=pl.BlockSpec(memory_space=pltpu.MemorySpace.VMEM),
    )(neg_gravity, vel.reshape(1, L))

    # These slices/reshapes fuse into the single jitted executable.
    dpos = out[0].reshape(vel.shape)
    dvel = out[1, : neg_gravity.shape[0]].reshape(neg_gravity.shape)
    dlog_radius = out[2, : log_radius.shape[0]].reshape(log_radius.shape)
    return dpos, dvel, dlog_radius


# -----------------------------------------------------------------------------
# Kernel 2: fused fixed-step integrator (whole loop in ONE pallas_call).
# All state lives on the scalar unit; only SMEM is touched.
# -----------------------------------------------------------------------------
def _fused_euler_kernel(init_ref, params_ref, pos_traj_ref, vel_traj_ref,
                        final_ref):
    """Semi-implicit Euler integration of the ball dynamics, N steps fused.

    init_ref     : SMEM (2,) f32 -- [pos0, vel0]
    params_ref   : SMEM (2,) f32 -- [-gravity, dt]
    pos_traj_ref : SMEM (N,) f32 -- position at the start of each step (output)
    vel_traj_ref : SMEM (N,) f32 -- velocity at the start of each step (output)
    final_ref    : SMEM (2,) f32 -- [pos, vel] after N steps (output)
    """
    neg_g = params_ref[0]
    dt = params_ref[1]
    n = pos_traj_ref.shape[0]

    def body(i, carry):
        pos, vel = carry
        pos_traj_ref[i] = pos
        vel_traj_ref[i] = vel
        vel = vel + neg_g * dt          # dvel = -gravity
        pos = pos + vel * dt            # dpos = vel
        return (pos, vel)

    pos_f, vel_f = jax.lax.fori_loop(0, n, body, (init_ref[0], init_ref[1]))
    final_ref[0] = pos_f
    final_ref[1] = vel_f


@functools.partial(jax.jit, static_argnames=("num_steps",))
def integrate_fixed_steps(pos0, vel0, neg_gravity, dt, num_steps):
    """Run `num_steps` of fixed-step integration in a single kernel launch."""
    init = jnp.concatenate([pos0.reshape(-1), vel0.reshape(-1)]).astype(jnp.float32)
    params = jnp.concatenate([neg_gravity.reshape(-1),
                              dt.reshape(-1)]).astype(jnp.float32)
    return pl.pallas_call(
        _fused_euler_kernel,
        out_shape=(
            jax.ShapeDtypeStruct((num_steps,), jnp.float32),  # pos trajectory
            jax.ShapeDtypeStruct((num_steps,), jnp.float32),  # vel trajectory
            jax.ShapeDtypeStruct((2,), jnp.float32),          # final [pos, vel]
        ),
        in_specs=[
            pl.BlockSpec(memory_space=pltpu.MemorySpace.SMEM),
            pl.BlockSpec(memory_space=pltpu.MemorySpace.SMEM),
        ],
        out_specs=(
            pl.BlockSpec(memory_space=pltpu.MemorySpace.SMEM),
            pl.BlockSpec(memory_space=pltpu.MemorySpace.SMEM),
            pl.BlockSpec(memory_space=pltpu.MemorySpace.SMEM),
        ),
    )(init, params)


class BouncingBallExamplePallas:
    """Deterministic parameter container mirroring the PyTorch __init__."""

    def __init__(self, radius=0.2, gravity=9.8):
        self.gravity = jnp.asarray([gravity], dtype=jnp.float32)
        # Precomputed once at construction time (drops the in-kernel negate).
        self.neg_gravity = jnp.asarray([-gravity], dtype=jnp.float32)
        self.log_radius = jnp.asarray([math.log(radius)], dtype=jnp.float32)
        self.t0 = jnp.asarray([0.0], dtype=jnp.float32)
        self.init_pos = jnp.asarray([10.0], dtype=jnp.float32)
        self.init_vel = jnp.asarray([0.0], dtype=jnp.float32)
        self.absorption = jnp.asarray([0.2], dtype=jnp.float32)

    def forward(self, t, state):
        return bouncing_ball_forward(t, state, self.neg_gravity)

    # Plain-JAX glue (not hot path), kept for parity with the module.
    def event_fn(self, t, state):
        pos, _, log_radius = state
        return pos - jnp.exp(log_radius)

    def get_initial_state(self):
        return (self.t0, (self.init_pos, self.init_vel, self.log_radius))

    def state_update(self, state):
        pos, vel, log_radius = state
        return (pos + 1e-07, -vel * (1.0 - self.absorption), log_radius)

    # TODO(synk): get_collision_times / simulate rely on torchdiffeq's adaptive
    # odeint / odeint_event (event detection); this fused fixed-step analogue
    # shows the single-launch integrator pattern instead.
    def integrate(self, dt, num_steps):
        return integrate_fixed_steps(
            self.init_pos, self.init_vel, self.neg_gravity,
            jnp.asarray([dt], dtype=jnp.float32), num_steps)


if __name__ == "__main__":
    key = jax.random.PRNGKey(0)
    k_t, k_pos, k_vel = jax.random.split(key, 3)

    model = BouncingBallExamplePallas(radius=0.2, gravity=9.8)

    # Shapes consistent with the module: t (1,), state = (pos (1,), vel (1,),
    # log_radius (1,)).
    t = jax.random.uniform(k_t, (1,), dtype=jnp.float32)
    pos = jax.random.uniform(k_pos, (1,), dtype=jnp.float32) * 10.0
    vel = jax.random.normal(k_vel, (1,), dtype=jnp.float32)
    log_radius = model.log_radius
    state = (pos, vel, log_radius)

    # --- forward dynamics check ---------------------------------------------
    dpos, dvel, dlogr = model.forward(t, state)
    jax.block_until_ready((dpos, dvel, dlogr))

    assert dpos.shape == vel.shape
    assert dvel.shape == model.gravity.shape
    assert dlogr.shape == log_radius.shape
    assert jnp.allclose(dpos, vel), "dpos mismatch"
    assert jnp.allclose(dvel, -model.gravity), "dvel mismatch"
    assert jnp.allclose(dlogr, jnp.zeros_like(log_radius)), "dlog_radius mismatch"

    # --- fused fixed-step integrator check -----------------------------------
    num_steps = 64
    dt = 0.01
    pos_traj, vel_traj, final_state = model.integrate(dt, num_steps)
    jax.block_until_ready((pos_traj, vel_traj, final_state))

    # Pure-Python reference of the same semi-implicit Euler scheme.
    p = float(model.init_pos[0])
    v = float(model.init_vel[0])
    g = float(model.neg_gravity[0])
    ref_p, ref_v = [], []
    for _ in range(num_steps):
        ref_p.append(p)
        ref_v.append(v)
        v = v + g * dt
        p = p + v * dt
    ref_p = jnp.asarray(ref_p, dtype=jnp.float32)
    ref_v = jnp.asarray(ref_v, dtype=jnp.float32)
    assert jnp.allclose(pos_traj, ref_p, atol=2e-4), "pos trajectory mismatch"
    assert jnp.allclose(vel_traj, ref_v, atol=2e-4), "vel trajectory mismatch"
    assert jnp.allclose(final_state, jnp.asarray([p, v], dtype=jnp.float32),
                        atol=2e-4), "final state mismatch"

    print("KERNEL_OK")
</pallas_src>

<mosaic_0001>
module attributes {stable_mosaic.version = 11 : i64} {
  func.func @_bouncing_ball_forward_kernel(%arg0: memref<1xf32, #tpu.memory_space<smem>>, %arg1: memref<1x1xf32, #tpu.memory_space<vmem>>, %arg2: memref<3x1xf32, #tpu.memory_space<vmem>>) attributes {dimension_semantics = [], scalar_prefetch = 0 : i64, scratch_operands = 0 : i64, tpu.core_type = #tpu.core_type<tc>} {
    %c0 = arith.constant 0 : index
    %c0_0 = arith.constant 0 : index
    %0 = vector.load %arg1[%c0, %c0_0] : memref<1x1xf32, #tpu.memory_space<vmem>>, vector<1x1xf32>
    %c0_1 = arith.constant 0 : index
    %c0_2 = arith.constant 0 : index
    %1 = vector.load %arg2[%c0_1, %c0_2] : memref<3x1xf32, #tpu.memory_space<vmem>>, vector<1x1xf32>
    tpu.vector_store %arg2[%c0_1, %c0_2], %0 {strides = array<i32>} : memref<3x1xf32, #tpu.memory_space<vmem>>, vector<1x1xf32>,
    %c0_3 = arith.constant 0 : index
    %2 = memref.load %arg0[%c0_3] : memref<1xf32, #tpu.memory_space<smem>>
    %3 = vector.broadcast %2 : f32 to vector<1x1xf32>
    %c1 = arith.constant 1 : index
    %c0_4 = arith.constant 0 : index
    %4 = vector.load %arg2[%c1, %c0_4] : memref<3x1xf32, #tpu.memory_space<vmem>>, vector<1x1xf32>
    tpu.vector_store %arg2[%c1, %c0_4], %3 {strides = array<i32>} : memref<3x1xf32, #tpu.memory_space<vmem>>, vector<1x1xf32>,
    %cst = arith.constant 0.000000e+00 : f32
    %5 = vector.broadcast %cst : f32 to vector<1x1xf32>
    %c2 = arith.constant 2 : index
    %c0_5 = arith.constant 0 : index
    %6 = vector.load %arg2[%c2, %c0_5] : memref<3x1xf32, #tpu.memory_space<vmem>>, vector<1x1xf32>
    tpu.vector_store %arg2[%c2, %c0_5], %5 {strides = array<i32>} : memref<3x1xf32, #tpu.memory_space<vmem>>, vector<1x1xf32>,
    return
  }
}

</mosaic_0001>

<bundles_post_ra>
// kernel: bouncing_ball_forward.1
= control target key start
LH: loop header
LB: loop body
LE: loop exit
PB: predicated region body
PF: predicated region fallthrough
CT: control target
= control target key end

     0   :  { %vm15_vm0 = vcmask 0   ;;  %v26_v2 = vmov 0.0   ;;  %s57_s1 = inlined_call_operand.<no memory space> [shape: f32[1,1], index: 1, kind: input, shape index: {}]   ;;  %s58_s2 = inlined_call_operand.vmem [shape: f32[3,1], index: 2, kind: output, shape index: {}]   ;;  %s59_s0 = inlined_call_operand.<no memory space> [shape: f32[1], index: 0, kind: input, shape index: {}]  }
   0x1   :  { %v8_v0 = vstv %s57_s1  ;;  %v18_v1 = vstv %s59_s0  ;;  %20 = vst.msk [vmem:[%s58_s2 + $0x2] sm:$0x1] %vm15_vm0, %v26_v2 }
   0x2   :  { %9 = vst [vmem:[#allocation3] sm:$0x1] %v8_v0 }
   0x3   :  { %19 = vst.msk [vmem:[%s58_s2 + $0x1] sm:$0x1] %vm15_vm0, %v18_v1 }
   0x9   :  { %v14_v3 = vld [vmem:[#allocation3] sm:$0x1] }
   0xa   :  { %16 = vst.msk [vmem:[%s58_s2] sm:$0x1] %vm15_vm0, %v14_v3 }

</bundles_post_ra>
